<compile_context>
chip_gen: v5e
topology: v5e:2x2
jax: 0.10.0
libtpu: 0.0.40
codegen_flags: <defaults>
</compile_context>

<pallas_src>
import jax
import jax.numpy as jnp
from jax.experimental import pallas as pl
from jax.experimental.pallas import tpu as pltpu

TILE_B = 512  # lanes per grid step; multiple of 128, tiny VMEM footprint


def _linear_sigmoid_kernel(params_ref, x_ref, o_ref):
    # params_ref: SMEM (4,)  -> [w0, w1, w2, b]
    # x_ref:      VMEM (3, TILE_B)   feature-major, batch on lanes
    # o_ref:      VMEM (1, TILE_B)
    w0 = params_ref[0]
    w1 = params_ref[1]
    w2 = params_ref[2]
    b = params_ref[3]
    x = x_ref[...]                                            # (3, TILE_B)
    # 3-term contraction on the VPU (no MXU), scalar * lane-dense vector.
    z = x[0:1, :] * w0 + x[1:2, :] * w1 + x[2:3, :] * w2 + b  # (1, TILE_B)
    o_ref[...] = jax.nn.sigmoid(z).astype(o_ref.dtype)        # exp -> EUP


def net_forward(x, weight, bias, *, tile_b=TILE_B):
    """Pallas equivalent of Net.forward.

    x:      (B, 3) or (3,) float32
    weight: (1, 3) float32  (PyTorch nn.Linear convention: (out, in))
    bias:   (1,)   float32
    returns (B, 1) float32
    """
    if x.ndim == 1:
        x = x[None, :]
    x = x.astype(jnp.float32)
    B, F = x.shape
    assert F == 3, f"expected 3 input features, got {F}"

    # Layout plumbing: feature-major so batch lands on the lane axis.
    xt = x.T                                   # (3, B)
    n_tiles = pl.cdiv(B, tile_b)
    b_pad = n_tiles * tile_b
    if b_pad != B:
        xt = jnp.pad(xt, ((0, 0), (0, b_pad - B)))

    # 4 scalars (w0, w1, w2, b) go to SMEM — no padded VMEM weight tile.
    params = jnp.concatenate(
        [weight.reshape(-1).astype(jnp.float32),
         bias.reshape(-1).astype(jnp.float32)]
    )  # (4,)

    out = pl.pallas_call(
        _linear_sigmoid_kernel,
        out_shape=jax.ShapeDtypeStruct((1, b_pad), jnp.float32),
        grid=(n_tiles,),
        in_specs=[
            pl.BlockSpec(memory_space=pltpu.MemorySpace.SMEM),   # params (whole, SMEM)
            pl.BlockSpec((F, tile_b), lambda i: (0, i)),         # x tile, lane-dense
        ],
        out_specs=pl.BlockSpec((1, tile_b), lambda i: (0, i)),   # lane-dense output
        compiler_params=pltpu.CompilerParams(
            dimension_semantics=("parallel",),                   # megacore on v7x
        ),
    )(params, xt)

    return out[:, :B].T                          # (B, 1)


def init_params():
    # Deterministic init mirroring the PyTorch module:
    #   weight ~ U(-0.01, 0.01) shape (1, 3); bias = 0 shape (1,)
    key = jax.random.PRNGKey(42)
    weight = jax.random.uniform(key, (1, 3), jnp.float32, minval=-0.01, maxval=0.01)
    bias = jnp.zeros((1,), jnp.float32)
    return weight, bias


if __name__ == "__main__":
    weight, bias = init_params()

    # Small batched input (matches the module's forward on 2-D input).
    key = jax.random.PRNGKey(0)
    B = 8
    x = jax.random.normal(key, (B, 3), jnp.float32)

    out = net_forward(x, weight, bias)
    jax.block_until_ready(out)
    ref = jax.nn.sigmoid(x @ weight.T + bias)
    assert out.shape == (B, 1)
    assert jnp.allclose(out, ref, atol=1e-6), "mismatch vs reference (B=8)"

    # Exercise the 1-D input path (x.dim() == 1 branch).
    x1d = jax.random.normal(jax.random.PRNGKey(1), (3,), jnp.float32)
    out1d = net_forward(x1d, weight, bias)
    jax.block_until_ready(out1d)
    ref1d = jax.nn.sigmoid(x1d[None, :] @ weight.T + bias)
    assert out1d.shape == (1, 1)
    assert jnp.allclose(out1d, ref1d, atol=1e-6), "mismatch vs reference (1-D)"

    # Exercise multi-tile + non-multiple-of-TILE_B padding path.
    B2 = 1000  # -> padded to 1024, grid of 2 tiles
    x2 = jax.random.normal(jax.random.PRNGKey(2), (B2, 3), jnp.float32)
    out2 = net_forward(x2, weight, bias)
    jax.block_until_ready(out2)
    ref2 = jax.nn.sigmoid(x2 @ weight.T + bias)
    assert out2.shape == (B2, 1)
    assert jnp.allclose(out2, ref2, atol=1e-6), "mismatch vs reference (B=1000)"

    print("KERNEL_OK")
</pallas_src>

<mosaic_0001>
module attributes {stable_mosaic.version = 11 : i64} {
  func.func @_linear_sigmoid_kernel(%arg0: i32, %arg1: memref<4xf32, #tpu.memory_space<smem>>, %arg2: memref<3x512xf32, #tpu.memory_space<vmem>>, %arg3: memref<1x512xf32, #tpu.memory_space<vmem>>) attributes {dimension_semantics = [#tpu.dimension_semantics<parallel>], iteration_bounds = array<i64: 1>, scalar_prefetch = 0 : i64, scratch_operands = 0 : i64, tpu.core_type = #tpu.core_type<tc>, window_params = [{transform_indices = @transform_0, window_bounds = array<i64: 4>}, {transform_indices = @transform_1, window_bounds = array<i64: 3, 512>}, {transform_indices = @transform_2, window_bounds = array<i64: 1, 512>}]} {
    %c0 = arith.constant 0 : index
    %0 = memref.load %arg1[%c0] : memref<4xf32, #tpu.memory_space<smem>>
    %c1 = arith.constant 1 : index
    %1 = memref.load %arg1[%c1] : memref<4xf32, #tpu.memory_space<smem>>
    %c2 = arith.constant 2 : index
    %2 = memref.load %arg1[%c2] : memref<4xf32, #tpu.memory_space<smem>>
    %c3 = arith.constant 3 : index
    %3 = memref.load %arg1[%c3] : memref<4xf32, #tpu.memory_space<smem>>
    %c0_0 = arith.constant 0 : index
    %c0_1 = arith.constant 0 : index
    %4 = vector.load %arg2[%c0_0, %c0_1] : memref<3x512xf32, #tpu.memory_space<vmem>>, vector<3x512xf32>
    %5 = vector.extract_strided_slice %4 {offsets = [0, 0], sizes = [1, 512], strides = [1, 1]} : vector<3x512xf32> to vector<1x512xf32>
    %6 = vector.broadcast %0 : f32 to vector<1x512xf32>
    %7 = arith.mulf %5, %6 : vector<1x512xf32>
    %8 = vector.extract_strided_slice %4 {offsets = [1, 0], sizes = [1, 512], strides = [1, 1]} : vector<3x512xf32> to vector<1x512xf32>
    %9 = vector.broadcast %1 : f32 to vector<1x512xf32>
    %10 = arith.mulf %8, %9 : vector<1x512xf32>
    %11 = arith.addf %7, %10 : vector<1x512xf32>
    %12 = vector.extract_strided_slice %4 {offsets = [2, 0], sizes = [1, 512], strides = [1, 1]} : vector<3x512xf32> to vector<1x512xf32>
    %13 = vector.broadcast %2 : f32 to vector<1x512xf32>
    %14 = arith.mulf %12, %13 : vector<1x512xf32>
    %15 = arith.addf %11, %14 : vector<1x512xf32>
    %16 = vector.broadcast %3 : f32 to vector<1x512xf32>
    %17 = arith.addf %15, %16 : vector<1x512xf32>
    %18 = arith.negf %17 : vector<1x512xf32>
    %19 = math.exp %18 : vector<1x512xf32>
    %cst = arith.constant 1.000000e+00 : f32
    %20 = vector.broadcast %cst : f32 to vector<1x512xf32>
    %21 = arith.addf %20, %19 : vector<1x512xf32>
    %22 = arith.divf %20, %21 : vector<1x512xf32>
    %c0_2 = arith.constant 0 : index
    %c0_3 = arith.constant 0 : index
    %23 = vector.load %arg3[%c0_2, %c0_3] : memref<1x512xf32, #tpu.memory_space<vmem>>, vector<1x512xf32>
    tpu.vector_store %arg3[%c0_2, %c0_3], %22 {strides = array<i32>} : memref<1x512xf32, #tpu.memory_space<vmem>>, vector<1x512xf32>,
    return
  }
  func.func @transform_0(%arg0: i32) -> i32 {
    %c0_i32 = arith.constant 0 : i32
    %c0_i32_0 = arith.constant 0 : i32
    return %c0_i32 : i32
  }
  func.func @transform_1(%arg0: i32) -> (i32, i32) {
    %c0_i32 = arith.constant 0 : i32
    %c0_i32_0 = arith.constant 0 : i32
    return %c0_i32, %arg0 : i32, i32
  }
  func.func @transform_2(%arg0: i32) -> (i32, i32) {
    %c0_i32 = arith.constant 0 : i32
    %c0_i32_0 = arith.constant 0 : i32
    return %c0_i32, %arg0 : i32, i32
  }
}

</mosaic_0001>

<bundles_post_ra>
// kernel: tpu_custom_call.1
= control target key start
LH: loop header
LB: loop body
LE: loop exit
PB: predicated region body
PF: predicated region fallthrough
CT: control target
= control target key end

     0   :  { %7 = vsyncpa [#allocation5], 0  ;;  %s263_s0 = inlined_call_operand.hbm [shape: f32[4], index: 0, kind: input, shape index: {}]   ;;  %s264_s1 = inlined_call_operand.hbm [shape: f32[3,512], index: 1, kind: input, shape index: {}]   ;;  %s265_s2 = inlined_call_operand.hbm [shape: f32[1,512], index: 2, kind: output, shape index: {}]  }
   0x1   :  { %8 = vsyncpa [#allocation3], 0 }
   0x2   :  { %9 = vsyncpa [#allocation4], 0  ;;  %s15_s11 = sshll.u32 %s263_s0, 4  ;;  %s24_s14 = sshll.u32 %s264_s1, 4  ;;  %s16_s11 = int_to_ptr.hbm [resolvable:$true] %s15_s11  ;;  %s25_s14 = int_to_ptr.hbm [resolvable:$true] %s24_s14 }
   0x3   :  { %s236_s15 = smov [#allocation2]   ;;  %s237_s16 = smov [#allocation6]  }
   0x4   :  { %18 = dma.hbm_to_smem %s16_s11, 16, %s236_s15, [#allocation5]  }
   0x5   :  { %s26_s17 = sshll.u32 %s237_s16, 4  ;;  %s27_s17 = int_to_ptr.vmem [resolvable:$true] %s26_s17 }
   0x6   :  { %29 = dma.hbm_to_vmem [thread:$0]  %s25_s14, 256, %s27_s17, [#allocation3]  }
   0x7   :  { %230 = dma.done.wait [#allocation5], 16  }
   0x8   :  { %231 = vsyncadd [#allocation5], 4294967280 }
   0x9   :  { %232 = dma.done.wait [#allocation3], 256  }
   0xa   :  { %233 = vsyncadd [#allocation3], 4294967040 }
   0xb   :  { %38 = sfence }
   0xc   :  { %s39_s18 = sld [smem:[#allocation2]]  ;;  %v43_v0 = vld [vmem:[#allocation6] sm:$0x77]  ;;  %v44_v1 = vld [vmem:[#allocation6 + $0x8] sm:$0x77]  ;;  %v127_v45 = vlaneseq  ;;  %vm120_vm8 = vcmask 1040384  }
   0xd   :  { %s150_s19 = sld [smem:[#allocation2 + $0x1]]  ;;  %vm122_vm9 = vcmask 1042434   ;;  %s238_s1 = smov [#allocation7]   ;;  %vm124_vm10 = vcmask 1041408  }
   0xe   :  { %s151_s0 = sld [smem:[#allocation2 + $0x2]]  ;;  %s137_s21 = sshll.u32 %s238_s1, 4  ;;  %vm129_vm11 = vcmp.lt.s32.totalorder %v127_v45, 512  ;;  %s138_s21 = int_to_ptr.vmem [resolvable:$true] %s137_s21 }
   0xf   :  { %s152_s20 = sld [smem:[#allocation2 + $0x3]]  ;;  %s139_s24 = sshll.u32 %s265_s2, 4  ;;  %s140_s24 = int_to_ptr.hbm [resolvable:$true] %s139_s24 }
  0x12   :  { %v45_v2 = vstv %s39_s18 }
  0x13   :  { %v46_v3 = vmul.f32 %v45_v2, %v43_v0  ;;  %v48_v4 = vstv %s150_s19  ;;  %v47_v5 = vmul.f32 %v45_v2, %v44_v1 }
  0x14   :  { %v49_v6 = vmul.f32 %v48_v4, %v43_v0  ;;  %v50_v7 = vmul.f32 %v48_v4, %v44_v1  ;;  %v61_v8 = vstv %s151_s0 }
  0x15   :  { %v62_v9 = vmul.f32 %v61_v8, %v43_v0  ;;  %v63_v10 = vmul.f32 %v61_v8, %v44_v1  ;;  %v74_v17 = vstv %s152_s20 }
  0x16   :  { %v153_v11 = vrot.slane %v49_v6, 9  ;;  %v154_v12 = vrot.slane %v50_v7, 9 }
  0x17   :  { %v155_v13 = vrot.slane %v62_v9, 10  ;;  %v156_v14 = vrot.slane %v63_v10, 10 }
  0x18   :  { %v59_v15 = vadd.f32 %v153_v11, %v46_v3  ;;  %v60_v16 = vadd.f32 %v154_v12, %v47_v5 }
  0x1a   :  { %v72_v18 = vadd.f32 %v155_v13, %v59_v15  ;;  %v73_v19 = vadd.f32 %v156_v14, %v60_v16 }
  0x1c   :  { %v75_v20 = vadd.f32 %v74_v17, %v72_v18  ;;  %v76_v21 = vadd.f32 %v74_v17, %v73_v19 }
  0x1e   :  { %v157_v22 = vmul.f32 -1.442695, %v75_v20  ;;  %v158_v23 = vmul.f32 -1.442695, %v76_v21 }
  0x20   :  { %162 = vpow2.f32 %v157_v22 }
  0x21   :  { %164 = vpow2.f32 %v158_v23 }
  0x26   :  { %v163_v24 = vpop.eup %162 }
  0x27   :  { %v165_v25 = vpop.eup %164  ;;  %v83_v26 = vadd.f32 1.0, %v163_v24 }
  0x28   :  { %v84_v27 = vadd.f32 1.0, %v165_v25 }
  0x29   :  { %166 = vrcp.f32 %v83_v26  ;;  %vm90_vm0 = vweird.f32 %v83_v26  ;;  %v96_v31 = vand.u32 2147483648, %v83_v26  ;;  %v94_v34 = vand.u32 2147483647, %v83_v26 }
  0x2a   :  { %168 = vrcp.f32 %v84_v27  ;;  %v111_v35 = vand.u32 2147483648, %v84_v27  ;;  %vm105_vm2 = vweird.f32 %v84_v27  ;;  %v109_v37 = vand.u32 2147483647, %v84_v27 }
  0x2b   :  { %v97_v39 = vor.u32 1.1754944e-38, %v96_v31  ;;  %vm95_vm5 = vcmp.eq.f32.partialorder %v94_v34, 8.507059e+37 }
  0x2c   :  { %v112_v42 = vor.u32 1.1754944e-38, %v111_v35  ;;  %vm110_vm7 = vcmp.eq.f32.partialorder %v109_v37, 8.507059e+37 }
  0x2f   :  { %v167_v28 = vpop.eup %166 }
  0x30   :  { %v169_v29 = vpop.eup %168  ;;  %v86_v30 = vmul.f32 %v167_v28, %v83_v26  ;;  %vm91_vm1 = vweird.f32 %v167_v28 }
  0x31   :  { %v101_v32 = vmul.f32 %v169_v29, %v84_v27  ;;  %vm106_vm3 = vweird.f32 %v169_v29  ;;  %vm92_vm4 = vmor %vm90_vm0, %vm91_vm1 }
  0x32   :  { %v87_v33 = vsub.f32 1.0, %v86_v30  ;;  %vm107_vm6 = vmor %vm105_vm2, %vm106_vm3 }
  0x33   :  { %v102_v36 = vsub.f32 1.0, %v101_v32 }
  0x34   :  { %v88_v38 = vmul.f32 %v167_v28, %v87_v33 }
  0x35   :  { %v103_v40 = vmul.f32 %v169_v29, %v102_v36 }
  0x36   :  { %v89_v41 = vadd.f32 %v167_v28, %v88_v38 }
  0x37   :  { %v104_v43 = vadd.f32 %v169_v29, %v103_v40 }
  0x38   :  { %v93_v44 = vsel %vm92_vm4, %v167_v28, %v89_v41 }
  0x39   :  { %v98_v46 = vsel %vm95_vm5, %v97_v39, %v93_v44  ;;  %v108_v47 = vsel %vm107_vm6, %v169_v29, %v104_v43 }
  0x3a   :  { %v113_v48 = vsel %vm110_vm7, %v112_v42, %v108_v47  ;;  %v117_v49 = vrot.slane %v98_v46, 3 }
  0x3b   :  { %v118_v50 = vrot.slane %v113_v48, 6  ;;  %v119_v51 = vrot.slane %v113_v48, 1 }
  0x3c   :  { %v121_v52 = vsel %vm120_vm8, %v98_v46, %v117_v49 }
  0x3d   :  { %v123_v53 = vsel %vm122_vm9, %v118_v50, %v119_v51 }
  0x3e   :  { %v125_v54 = vsel %vm124_vm10, %v121_v52, %v123_v53 }
  0x3f   :  { %131 = vst.msk [vmem:[#allocation7] sm:$0xf] %vm129_vm11, %v125_v54 }
  0x40   :  { %142 = dma.vmem_to_hbm [thread:$0]  %s138_s21, 64, %s140_s24, [#allocation4]  }
  0x41   :  { %234 = dma.done.wait [#allocation4], 64  }
  0x42   :  { %235 = vsyncadd [#allocation4], 4294967232 }
  0x43   :  { %147 = vsyncpa [#allocation3], 1 }
  0x44   :  { %148 = vsyncpa [#allocation4], 1 }
  0x45   :  { %149 = vsyncpa [#allocation5], 1 }

</bundles_post_ra>
